<compile_context>
chip_gen: v6e
topology: v6e:2x2x1
jax: 0.10.0
libtpu: 0.0.40
codegen_flags: <defaults>
</compile_context>

<pallas_src>
import functools

import jax
import jax.numpy as jnp
from jax.experimental import pallas as pl
from jax.experimental.pallas import tpu as pltpu


# ---------------------------------------------------------------------------
# Fused kernel:
#   t = relu(x@W1+b1)@W2+b2 ; logits = t@Wh_packed+bh_packed ;
#   per-head softmax over the packed class slices, written with ONE store.
# ---------------------------------------------------------------------------
def divdis_kernel(x_ref, w1_ref, b1_ref, w2_ref, b2_ref, wh_ref, bh_ref,
                  sel_ref, selt_ref, out_ref, *, n_heads, n_classes):
    f32 = jnp.float32

    # Backbone MLP: matmuls in the (possibly bf16) storage dtype, f32 MXU
    # accumulation; bias/ReLU in f32 (keep elementwise f32 for v5e).
    h = jnp.dot(x_ref[...], w1_ref[...], preferred_element_type=f32)
    h = jnp.maximum(h + b1_ref[...], 0.0)
    t = jnp.dot(h.astype(w2_ref.dtype), w2_ref[...], preferred_element_type=f32)
    t = t + b2_ref[...]

    # All heads' logits from ONE MXU op: (tb, n_output) @ (n_output, H*C).
    logits = jnp.dot(t.astype(wh_ref.dtype), wh_ref[...],
                     preferred_element_type=f32)
    logits = logits + bh_ref[...]                     # (tb, H*C) f32

    C = n_classes
    # Per-head max: n_heads tiny slice reductions, packed to (tb, n_heads).
    maxes = jnp.concatenate(
        [jnp.max(logits[:, hd * C:(hd + 1) * C], axis=-1, keepdims=True)
         for hd in range(n_heads)], axis=-1)
    # Broadcast maxes back to (tb, H*C) on the MXU (selt is a 0/1 selector).
    m_full = jnp.dot(maxes, selt_ref[...], preferred_element_type=f32)

    # ONE full-width exp (EUP) over all heads at once.
    e = jnp.exp(logits - m_full)

    # Per-head denominators on the MXU: (tb, H*C) @ (H*C, H) one-hot matmul.
    denom = jnp.dot(e, sel_ref[...], preferred_element_type=f32)
    inv = pl.reciprocal(denom)          # EXACT: rows must sum to 1 downstream
    inv_full = jnp.dot(inv, selt_ref[...], preferred_element_type=f32)

    # ONE lane-dense full-width store in the final (b, head, class) order.
    out_ref[...] = (e * inv_full).astype(out_ref.dtype)


# ---------------------------------------------------------------------------
# One-time parameter preparation (hoisted out of the forward call).
# ---------------------------------------------------------------------------
def prepare_params(params, *, mxu_dtype=jnp.bfloat16):
    """Pack head weights, build 0/1 head selectors, cast MXU operands."""
    n_heads, n_output, n_classes = params["wh"].shape
    hc = n_heads * n_classes
    # Pack so all heads' logits come out of one matmul, in the final
    # (b, head, class) memory order -> output reshape is a pure view.
    wh_packed = jnp.transpose(params["wh"], (1, 0, 2)).reshape(n_output, hc)
    # sel[i, h] = 1 iff packed column i belongs to head h.
    sel = jnp.repeat(jnp.eye(n_heads, dtype=jnp.float32), n_classes, axis=0)
    return {
        "w1": params["w1"].astype(mxu_dtype),
        "b1": params["b1"].reshape(1, -1).astype(jnp.float32),
        "w2": params["w2"].astype(mxu_dtype),
        "b2": params["b2"].reshape(1, -1).astype(jnp.float32),
        "wh": wh_packed.astype(mxu_dtype),
        "bh": params["bh"].reshape(1, hc).astype(jnp.float32),
        "sel": sel,                 # (hc, n_heads) f32
        "sel_t": sel.T,             # (n_heads, hc) f32
        "n_heads": int(n_heads),
        "n_classes": int(n_classes),
        "mxu_dtype": mxu_dtype,
    }


def divdis_forward(x, prep, *, tile_b=2048, out_dtype=jnp.float32,
                   dim_semantics=("parallel",)):
    """Training-mode forward: returns [B, n_heads, n_classes].

    On v7x pass dim_semantics=(pltpu.CORE_PARALLEL,) to shard the batch grid
    axis across both TensorCores; on v5e/v6e "parallel" is sufficient.
    """
    B, d_in = x.shape
    n_heads, n_classes = prep["n_heads"], prep["n_classes"]
    hc = n_heads * n_classes
    hidden = prep["w1"].shape[1]
    n_output = prep["w2"].shape[1]

    # Cast the streaming operand once in the wrapper (halves the HBM read).
    x_c = x.astype(prep["mxu_dtype"])
    args = (x_c, prep["w1"], prep["b1"], prep["w2"], prep["b2"],
            prep["wh"], prep["bh"], prep["sel"], prep["sel_t"])
    kernel = functools.partial(divdis_kernel, n_heads=n_heads,
                               n_classes=n_classes)

    if B <= tile_b:
        # Small batch: no grid, every operand resident in VMEM.
        out_flat = pl.pallas_call(
            kernel,
            out_shape=jax.ShapeDtypeStruct((B, hc), out_dtype),
            in_specs=[pl.BlockSpec(memory_space=pltpu.MemorySpace.VMEM)] * 9,
            out_specs=pl.BlockSpec(memory_space=pltpu.MemorySpace.VMEM),
        )(*args)
    else:
        # Large batch: tile the batch axis; weights/selectors stay resident
        # every grid step.  tile_b=2048 double-buffered is well under the
        # scoped VMEM default even on v7x (raise vmem_limit_bytes if you
        # enlarge tiles or the backbone dims grow).
        out_flat = pl.pallas_call(
            kernel,
            out_shape=jax.ShapeDtypeStruct((B, hc), out_dtype),
            grid=(pl.cdiv(B, tile_b),),
            in_specs=[
                pl.BlockSpec((tile_b, d_in), lambda i: (i, 0)),
                pl.BlockSpec((d_in, hidden), lambda i: (0, 0)),
                pl.BlockSpec((1, hidden), lambda i: (0, 0)),
                pl.BlockSpec((hidden, n_output), lambda i: (0, 0)),
                pl.BlockSpec((1, n_output), lambda i: (0, 0)),
                pl.BlockSpec((n_output, hc), lambda i: (0, 0)),
                pl.BlockSpec((1, hc), lambda i: (0, 0)),
                pl.BlockSpec((hc, n_heads), lambda i: (0, 0)),
                pl.BlockSpec((n_heads, hc), lambda i: (0, 0)),
            ],
            out_specs=pl.BlockSpec((tile_b, hc), lambda i: (i, 0)),
            compiler_params=pltpu.CompilerParams(
                dimension_semantics=dim_semantics),
        )(*args)

    # torch.stack(preds, dim=1): [B, n_heads, n_classes] -- reshape is a view.
    return out_flat.reshape(B, n_heads, n_classes)


# ---------------------------------------------------------------------------
# References / fallback.
# ---------------------------------------------------------------------------
def divdis_forward_xla(x, params):
    """Plain-XLA fallback (recommended for tiny B where launch overhead wins)."""
    return divdis_reference_f32(x, params)


def divdis_reference_f32(x, params):
    """Pure-f32 JAX reference (module semantics)."""
    h = jnp.maximum(x @ params["w1"] + params["b1"], 0.0)
    t = h @ params["w2"] + params["b2"]
    logits = jnp.einsum("bo,hoc->bhc", t, params["wh"]) + params["bh"][None]
    return jax.nn.softmax(logits, axis=-1)


def divdis_reference_mxu(x, params, mxu_dtype=jnp.bfloat16):
    """Reference that mimics the kernel's dtype handling (bf16 MXU, f32 acc)."""
    f32 = jnp.float32
    h = jnp.dot(x.astype(mxu_dtype), params["w1"].astype(mxu_dtype),
                preferred_element_type=f32) + params["b1"]
    h = jnp.maximum(h, 0.0)
    t = jnp.dot(h.astype(mxu_dtype), params["w2"].astype(mxu_dtype),
                preferred_element_type=f32) + params["b2"]
    logits = jnp.einsum("bo,hoc->bhc", t.astype(mxu_dtype),
                        params["wh"].astype(mxu_dtype),
                        preferred_element_type=f32) + params["bh"][None]
    return jax.nn.softmax(logits.astype(f32), axis=-1)


def init_params(key, d_in, hidden, n_output, n_heads, n_classes):
    """Deterministic PyTorch-style uniform(-1/sqrt(fan_in), 1/sqrt(fan_in)) init."""
    ks = jax.random.split(key, 6)

    def u(k, shape, fan_in):
        lim = 1.0 / jnp.sqrt(jnp.float32(fan_in))
        return jax.random.uniform(k, shape, jnp.float32, -lim, lim)

    return {
        "w1": u(ks[0], (d_in, hidden), d_in),
        "b1": u(ks[1], (hidden,), d_in),
        "w2": u(ks[2], (hidden, n_output), hidden),
        "b2": u(ks[3], (n_output,), hidden),
        "wh": u(ks[4], (n_heads, n_output, n_classes), n_output),
        "bh": u(ks[5], (n_heads, n_classes), n_output),
    }


if __name__ == "__main__":
    d_in, hidden, n_output, n_heads, n_classes = 32, 64, 32, 3, 8

    key = jax.random.PRNGKey(0)
    k_x, k_x2, k_p = jax.random.split(key, 3)
    params = init_params(k_p, d_in, hidden, n_output, n_heads, n_classes)
    prep = prepare_params(params)        # one-time packing + bf16 cast

    # ---- small batch: single un-gridded pallas_call -----------------------
    B = 8
    x = jax.random.normal(k_x, (B, d_in), jnp.float32)
    out = divdis_forward(x, prep)
    jax.block_until_ready(out)

    assert out.shape == (B, n_heads, n_classes)
    ref_mxu = divdis_reference_mxu(x, params)
    assert jnp.allclose(out, ref_mxu, rtol=1e-4, atol=1e-4), \
        "mismatch vs bf16-MXU reference"
    # Semantics vs the pure-f32 module (only bf16 quantization noise differs).
    assert jnp.allclose(out, divdis_reference_f32(x, params),
                        rtol=2e-2, atol=2e-2), "mismatch vs f32 reference"
    # Exact reciprocal -> each head's softmax row sums to 1 tightly.
    assert jnp.allclose(jnp.sum(out, axis=-1), 1.0, atol=1e-5)

    # ---- batch-tiled grid path (incl. partial tail block) -----------------
    B2, tile_b = 320, 128
    x2 = jax.random.normal(k_x2, (B2, d_in), jnp.float32)
    out2 = divdis_forward(x2, prep, tile_b=tile_b)
    jax.block_until_ready(out2)

    assert out2.shape == (B2, n_heads, n_classes)
    assert jnp.allclose(out2, divdis_reference_mxu(x2, params),
                        rtol=1e-4, atol=1e-4), "grid path mismatch"
    assert jnp.allclose(jnp.sum(out2, axis=-1), 1.0, atol=1e-5)

    print("KERNEL_OK")
</pallas_src>

<mosaic_0001>
module attributes {stable_mosaic.version = 11 : i64} {
  func.func @divdis_kernel(%arg0: memref<8x32xbf16, #tpu.memory_space<vmem>>, %arg1: memref<32x64xbf16, #tpu.memory_space<vmem>>, %arg2: memref<1x64xf32, #tpu.memory_space<vmem>>, %arg3: memref<64x32xbf16, #tpu.memory_space<vmem>>, %arg4: memref<1x32xf32, #tpu.memory_space<vmem>>, %arg5: memref<32x24xbf16, #tpu.memory_space<vmem>>, %arg6: memref<1x24xf32, #tpu.memory_space<vmem>>, %arg7: memref<24x3xf32, #tpu.memory_space<vmem>>, %arg8: memref<3x24xf32, #tpu.memory_space<vmem>>, %arg9: memref<8x24xf32, #tpu.memory_space<vmem>>) attributes {dimension_semantics = [], scalar_prefetch = 0 : i64, scratch_operands = 0 : i64, tpu.core_type = #tpu.core_type<tc>} {
    %c0 = arith.constant 0 : index
    %c0_0 = arith.constant 0 : index
    %0 = vector.load %arg0[%c0, %c0_0] : memref<8x32xbf16, #tpu.memory_space<vmem>>, vector<8x32xbf16>
    %c0_1 = arith.constant 0 : index
    %c0_2 = arith.constant 0 : index
    %1 = vector.load %arg1[%c0_1, %c0_2] : memref<32x64xbf16, #tpu.memory_space<vmem>>, vector<32x64xbf16>
    %cst = arith.constant dense<0.000000e+00> : vector<8x64xf32>
    %2 = tpu.matmul %0, %1, %cst {dimension_numbers = #tpu.dot_dimension_numbers<[1], [0], [0], [1], [0, 0, 1, 1], [], []>} : vector<8x32xbf16>, vector<32x64xbf16>, vector<8x64xf32> -> vector<8x64xf32>
    %c0_3 = arith.constant 0 : index
    %c0_4 = arith.constant 0 : index
    %3 = vector.load %arg2[%c0_3, %c0_4] : memref<1x64xf32, #tpu.memory_space<vmem>>, vector<1x64xf32>
    %4 = vector.broadcast %3 : vector<1x64xf32> to vector<8x64xf32>
    %5 = arith.addf %2, %4 : vector<8x64xf32>
    %cst_5 = arith.constant 0.000000e+00 : f32
    %6 = vector.broadcast %cst_5 : f32 to vector<8x64xf32>
    %7 = arith.maximumf %5, %6 : vector<8x64xf32>
    %8 = arith.truncf %7 : vector<8x64xf32> to vector<8x64xbf16>
    %c0_6 = arith.constant 0 : index
    %c0_7 = arith.constant 0 : index
    %9 = vector.load %arg3[%c0_6, %c0_7] : memref<64x32xbf16, #tpu.memory_space<vmem>>, vector<64x32xbf16>
    %cst_8 = arith.constant dense<0.000000e+00> : vector<8x32xf32>
    %10 = tpu.matmul %8, %9, %cst_8 {dimension_numbers = #tpu.dot_dimension_numbers<[1], [0], [0], [1], [0, 0, 1, 1], [], []>} : vector<8x64xbf16>, vector<64x32xbf16>, vector<8x32xf32> -> vector<8x32xf32>
    %c0_9 = arith.constant 0 : index
    %c0_10 = arith.constant 0 : index
    %11 = vector.load %arg4[%c0_9, %c0_10] : memref<1x32xf32, #tpu.memory_space<vmem>>, vector<1x32xf32>
    %12 = vector.broadcast %11 : vector<1x32xf32> to vector<8x32xf32>
    %13 = arith.addf %10, %12 : vector<8x32xf32>
    %14 = arith.truncf %13 : vector<8x32xf32> to vector<8x32xbf16>
    %c0_11 = arith.constant 0 : index
    %c0_12 = arith.constant 0 : index
    %15 = vector.load %arg5[%c0_11, %c0_12] : memref<32x24xbf16, #tpu.memory_space<vmem>>, vector<32x24xbf16>
    %cst_13 = arith.constant dense<0.000000e+00> : vector<8x24xf32>
    %16 = tpu.matmul %14, %15, %cst_13 {dimension_numbers = #tpu.dot_dimension_numbers<[1], [0], [0], [1], [0, 0, 1, 1], [], []>} : vector<8x32xbf16>, vector<32x24xbf16>, vector<8x24xf32> -> vector<8x24xf32>
    %c0_14 = arith.constant 0 : index
    %c0_15 = arith.constant 0 : index
    %17 = vector.load %arg6[%c0_14, %c0_15] : memref<1x24xf32, #tpu.memory_space<vmem>>, vector<1x24xf32>
    %18 = vector.broadcast %17 : vector<1x24xf32> to vector<8x24xf32>
    %19 = arith.addf %16, %18 : vector<8x24xf32>
    %20 = vector.extract_strided_slice %19 {offsets = [0, 0], sizes = [8, 8], strides = [1, 1]} : vector<8x24xf32> to vector<8x8xf32>
    %cst_16 = arith.constant dense<0xFF800000> : vector<8xf32>
    %21 = vector.multi_reduction <maximumf>, %20, %cst_16 [1] : vector<8x8xf32> to vector<8xf32>
    %22 = vector.shape_cast %21 : vector<8xf32> to vector<8x1xf32>
    %23 = vector.extract_strided_slice %19 {offsets = [0, 8], sizes = [8, 8], strides = [1, 1]} : vector<8x24xf32> to vector<8x8xf32>
    %cst_17 = arith.constant dense<0xFF800000> : vector<8xf32>
    %24 = vector.multi_reduction <maximumf>, %23, %cst_17 [1] : vector<8x8xf32> to vector<8xf32>
    %25 = vector.shape_cast %24 : vector<8xf32> to vector<8x1xf32>
    %26 = vector.extract_strided_slice %19 {offsets = [0, 16], sizes = [8, 8], strides = [1, 1]} : vector<8x24xf32> to vector<8x8xf32>
    %cst_18 = arith.constant dense<0xFF800000> : vector<8xf32>
    %27 = vector.multi_reduction <maximumf>, %26, %cst_18 [1] : vector<8x8xf32> to vector<8xf32>
    %28 = vector.shape_cast %27 : vector<8xf32> to vector<8x1xf32>
    %29 = tpu.concatenate %22, %25, %28 in 1 : vector<8x1xf32>, vector<8x1xf32>, vector<8x1xf32> -> vector<8x3xf32>
    %c0_19 = arith.constant 0 : index
    %c0_20 = arith.constant 0 : index
    %30 = vector.load %arg8[%c0_19, %c0_20] : memref<3x24xf32, #tpu.memory_space<vmem>>, vector<3x24xf32>
    %cst_21 = arith.constant dense<0.000000e+00> : vector<8x24xf32>
    %31 = tpu.matmul %29, %30, %cst_21 {dimension_numbers = #tpu.dot_dimension_numbers<[1], [0], [0], [1], [0, 0, 1, 1], [], []>} : vector<8x3xf32>, vector<3x24xf32>, vector<8x24xf32> -> vector<8x24xf32>
    %32 = arith.subf %19, %31 : vector<8x24xf32>
    %33 = math.exp %32 : vector<8x24xf32>
    %c0_22 = arith.constant 0 : index
    %c0_23 = arith.constant 0 : index
    %34 = vector.load %arg7[%c0_22, %c0_23] : memref<24x3xf32, #tpu.memory_space<vmem>>, vector<24x3xf32>
    %cst_24 = arith.constant dense<0.000000e+00> : vector<8x3xf32>
    %35 = tpu.matmul %33, %34, %cst_24 {dimension_numbers = #tpu.dot_dimension_numbers<[1], [0], [0], [1], [0, 0, 1, 1], [], []>} : vector<8x24xf32>, vector<24x3xf32>, vector<8x3xf32> -> vector<8x3xf32>
    %36 = tpu.reciprocal %35 : vector<8x3xf32> -> vector<8x3xf32>
    %c0_25 = arith.constant 0 : index
    %c0_26 = arith.constant 0 : index
    %37 = vector.load %arg8[%c0_25, %c0_26] : memref<3x24xf32, #tpu.memory_space<vmem>>, vector<3x24xf32>
    %cst_27 = arith.constant dense<0.000000e+00> : vector<8x24xf32>
    %38 = tpu.matmul %36, %37, %cst_27 {dimension_numbers = #tpu.dot_dimension_numbers<[1], [0], [0], [1], [0, 0, 1, 1], [], []>} : vector<8x3xf32>, vector<3x24xf32>, vector<8x24xf32> -> vector<8x24xf32>
    %39 = arith.mulf %33, %38 : vector<8x24xf32>
    %c0_28 = arith.constant 0 : index
    %c0_29 = arith.constant 0 : index
    %40 = vector.load %arg9[%c0_28, %c0_29] : memref<8x24xf32, #tpu.memory_space<vmem>>, vector<8x24xf32>
    tpu.vector_store %arg9[%c0_28, %c0_29], %39 {strides = array<i32>} : memref<8x24xf32, #tpu.memory_space<vmem>>, vector<8x24xf32>,
    return
  }
}

</mosaic_0001>

<bundles_post_ra>
// kernel: tpu_custom_call.1
= control target key start
LH: loop header
LB: loop body
LE: loop exit
PB: predicated region body
PF: predicated region fallthrough
CT: control target
= control target key end

     0   :  { %v641_v1 = vmov 0.0   ;;  %vm642_vm0 = vmmov 0   ;;  %vm58_vm1 = vcmask 261120   ;;  %s776_s0 = inlined_call_operand.vmem [shape: bf16[8,32], index: 0, kind: input, shape index: {}]   ;;  %s777_s1 = inlined_call_operand.vmem [shape: bf16[32,64], index: 1, kind: input, shape index: {}]   ;;  %s778_s2 = inlined_call_operand.vmem [shape: f32[1,64], index: 2, kind: input, shape index: {}]   ;;  %s779_s3 = inlined_call_operand.vmem [shape: bf16[64,32], index: 3, kind: input, shape index: {}]   ;;  %s780_s4 = inlined_call_operand.vmem [shape: f32[1,32], index: 4, kind: input, shape index: {}]   ;;  %s781_s5 = inlined_call_operand.vmem [shape: bf16[32,24], index: 5, kind: input, shape index: {}]   ;;  %s782_s6 = inlined_call_operand.vmem [shape: f32[1,24], index: 6, kind: input, shape index: {}]   ;;  %s783_s7 = inlined_call_operand.vmem [shape: f32[24,3], index: 7, kind: input, shape index: {}]   ;;  %s784_s8 = inlined_call_operand.vmem [shape: f32[3,24], index: 8, kind: input, shape index: {}]   ;;  %s785_s9 = inlined_call_operand.hbm [shape: f32[8,24], index: 9, kind: output, shape index: {}]  }
   0x1   :  { %v607_v0 = vld [vmem:[%s777_s1 + $0x8] sm:$0xff]   ;;  %557 = vmatprep.subr.bf16.mxu0 %v641_v1  ;;  %565 = vmatprep.subr.bf16.mxu1 %v641_v1  ;;  %v608_v2 = vld [vmem:[%s777_s1] sm:$0xff]   ;;  %v609_v3 = vld [vmem:[%s779_s3 + $0x18] sm:$0xff]  }
   0x2   :  { %558 = vmatpush3.bf16.msra.mxu0 %v607_v0  ;;  %561 = vmatprep.mubr.msk.bf16.mxu0 %vm642_vm0, %v641_v1  ;;  %v34_v4 = vld [vmem:[%s776_s0] sm:$0xf]  ;;  %v610_v5 = vld [vmem:[%s779_s3 + $0x10] sm:$0xff]  }
   0x3   :  { %559 = vmatprep.subr.bf16.mxu0 %v641_v1  ;;  %573 = vmatprep.mubr.msk.bf16.mxu1 %vm642_vm0, %v641_v1 }
   0x4   :  { %566 = vmatpush3.bf16.msra.mxu1 %v609_v3 }
   0x5   :  { %567 = vmatprep.subr.bf16.mxu1 %v641_v1 }
   0x6   :  { %560 = vmatpush3.bf16.msra.mxu0 %v608_v2 }
   0x7   :  { %577 = vmatprep.subr.bf16.mxu0 %v641_v1 }
   0x8   :  { %14 = vsyncpa [#allocation3], 0  ;;  %568 = vmatpush3.bf16.msra.mxu1 %v610_v5  ;;  %v611_v6 = vld [vmem:[%s779_s3 + $0x8] sm:$0xff]   ;;  %v612_v7 = vld [vmem:[%s779_s3] sm:$0xff]   ;;  %vm143_vm2 = vcmask 523264   ;;  %vm275_vm3 = vcmask 1042432  }
   0x9   :  { %562 = vmatmul.mubr.msk.bf16.vlgmr.msra.gmra.mxu0 %vm58_vm1, %v34_v4  ;;  %569 = vmatprep.subr.bf16.mxu1 %v641_v1  ;;  %v613_v8 = vld [vmem:[%s781_s5 + $0x8] sm:$0xff]   ;;  %v519_v9 = vld [vmem:[%s778_s2] ss:$0 sm:$0xff]  ;;  %vm262_vm4 = vcmask 195712   ;;  %vm254_vm5 = vcmask 64512   ;;  %vm258_vm6 = vcmask 130112  }
   0xa   :  { %581 = vmatprep.mubr.msk.bf16.mxu0 %vm642_vm0, %v641_v1  ;;  %578 = vmatpush3.bf16.msra.mxu0 %v613_v8  ;;  %v614_v17 = vld [vmem:[%s781_s5] sm:$0xff]   ;;  %vm266_vm7 = vcmask 7168   ;;  %vm268_vm8 = vcmask 15360   ;;  %vm271_vm9 = vcmask 23552   ;;  %v354_v40 = vld [vmem:[%s783_s7 + $0x10] sm:$0xff]  ;;  %v353_v41 = vld [vmem:[%s783_s7 + $0x8] sm:$0xff] }
   0xb   :  { %579 = vmatprep.subr.bf16.mxu0 %v641_v1  ;;  %v523_v18 = vld [vmem:[%s780_s4] ss:$0 sm:$0xff]  ;;  %vm355_vm10 = vcmask 195584   ;;  %s643_s12 = smov [#allocation2]  }
   0xc   :  { %570 = vmatpush3.bf16.msra.mxu1 %v611_v6  ;;  %v270_v25 = vld [vmem:[%s784_s8] sm:$0x7] }
   0xd   :  { %571 = vmatprep.subr.bf16.mxu1 %v641_v1  ;;  %v529_v26 = vld [vmem:[%s782_s6] ss:$0 sm:$0xff] }
   0xe   :  { %580 = vmatpush3.bf16.msra.mxu0 %v614_v17  ;;  %v352_v42 = vld [vmem:[%s783_s7] sm:$0xff]  ;;  %s511_s7 = sshll.u32 %s643_s12, 4  ;;  %s512_s7 = int_to_ptr.vmem [resolvable:$true] %s511_s7 }
   0xf   :  { %585 = vmatprep.subr.mxu0 %v641_v1  ;;  %s619_s13 = scalar_lea.vmem %s512_s7, 128  ;;  %p624_p1 = scmp.lt.s32.totalorder %s512_s7, %s512_s7 }
  0x10   :  { %572 = vmatpush3.bf16.msra.mxu1 %v612_v7  ;;  %p620_p0 = scmp.ne.s32.totalorder %s512_s7, %s619_s13  ;;  %p625_p2 = scmp.lt.s32.totalorder %s619_s13, %s619_s13 }
  0x11   :  { %590 = vmatprep.subr.mxu1 %v641_v1 }
  0x12   :  { %p626_p3 = por %p625_p2, %p624_p1 }
  0x14   :  { %p627_p4 = pnand %p626_p3, %p620_p0 }
  0xc9   :  { %v96_v10 = vpop.f32.mrf.mxu0 }
  0xca   :  { %v97_v11 = vadd.f32 %v519_v9, %v96_v10 }
  0xcb   :  { %v563_v12 = vpop.f32.mrf.mxu0 }
  0xcc   :  { %v102_v13 = vmax.f32 %v97_v11, 0.0 }
  0xcd   :  { %v99_v14 = vpop.f32.mrf.mxu0 }
  0xce   :  { %v103_v15 = vpack.c.bf16 %v102_v13, %v102_v13 }
  0xcf   :  { %v564_v16 = vpop.f32.mrf.mxu0 }
  0xd0   :  { %574 = vmatmul.mubr.msk.bf16.vlgmr.msra.gmra.mxu1 %vm143_vm2, %v103_v15 }
  0xd1   :  { %596 = vmatprep.mubr.msk.f32.mxu1 %vm642_vm0, %v641_v1  ;;  %591 = vmatpush3.msra.mxu1 %v354_v40 }
  0xd2   :  { %592 = vmatprep.subr.mxu1 %v641_v1 }
  0xd3   :  { %593 = vmatpush3.msra.mxu1 %v353_v41 }
  0xd4   :  { %594 = vmatprep.subr.mxu1 %v641_v1 }
  0xd5   :  { %595 = vmatpush3.msra.mxu1 %v352_v42 }
 0x190   :  { %v181_v19 = vpop.f32.mrf.mxu1 }
 0x191   :  { %v182_v20 = vadd.f32 %v523_v18, %v181_v19 }
 0x192   :  { %v575_v21 = vpop.f32.mrf.mxu1 }
 0x193   :  { %v187_v22 = vpack.c.bf16 %v182_v20, %v182_v20 }
 0x194   :  { %v184_v23 = vpop.f32.mrf.mxu1 }
 0x195   :  { %582 = vmatmul.mubr.msk.bf16.vlgmr.msra.gmra.mxu0 %vm58_vm1, %v187_v22 }
 0x196   :  { %v576_v24 = vpop.f32.mrf.mxu1  ;;  %587 = vmatprep.mubr.msk.f32.mxu0 %vm642_vm0, %v641_v1  ;;  %586 = vmatpush3.msk.msra.mxu0 %vm275_vm3, %v270_v25 }
 0x197   :  { %599 = vmatprep.subr.mxu0 %v641_v1 }
 0x255   :  { %v248_v27 = vpop.f32.mrf.mxu0 }
 0x256   :  { %v249_v28 = vadd.f32 %v529_v26, %v248_v27 }
 0x257   :  { %v583_v29 = vpop.f32.mrf.mxu0 }
 0x258   :  { %v263_v30 = vsel %vm262_vm4, %v249_v28, -inf  ;;  %v255_v31 = vsel %vm254_vm5, %v249_v28, -inf  ;;  %v259_v34 = vsel %vm258_vm6, %v249_v28, -inf }
 0x259   :  { %264 = vmax.xlane.f32.xlu1 %v263_v30  ;;  %256 = vmax.xlane.f32.xlu0 %v255_v31  ;;  %v251_v32 = vpop.f32.mrf.mxu0 }
 0x25b   :  { %v584_v33 = vpop.f32.mrf.mxu0 }
 0x25d   :  { %260 = vmax.xlane.f32.xlu0 %v259_v34 }
 0x2e2   :  { %v257_v35 = vpop.xlane.xlu0 %256  ;;  %v265_v37 = vpop.xlane.xlu1 %264 }
 0x2e6   :  { %v261_v36 = vpop.xlane.xlu0 %260 }
 0x2e7   :  { %v267_v38 = vsel %vm266_vm7, %v257_v35, %v261_v36 }
 0x2e8   :  { %v269_v39 = vsel %vm268_vm8, %v267_v38, %v265_v37 }
 0x2e9   :  { %588 = vmatmul.mubr.msk.f32.vlgmr.msra.gmra.mxu0 %vm271_vm9, %v269_v39 }
 0x2ea   :  { %600 = vmatpush3.msk.msra.mxu0 %vm275_vm3, %v270_v25  ;;  %601 = vmatprep.mubr.msk.f32.mxu0 %vm642_vm0, %v641_v1 }
 0x3a9   :  { %v345_v43 = vpop.f32.mrf.mxu0 }
 0x3aa   :  { %v349_v44 = vsub.f32 %v249_v28, %v345_v43 }
 0x3ab   :  { %v589_v45 = vpop.f32.mrf.mxu0 }
 0x3ac   :  { %v350_v46 = vmul.f32 1.442695, %v349_v44 }
 0x3ae   :  { %615 = vpow2.f32 %v350_v46 }
 0x3bb   :  { %v616_v47 = vpop.eup %615 }
 0x3bc   :  { %597 = vmatmul.mubr.msk.f32.vlgmr.msra.gmra.mxu1 %vm355_vm10, %v616_v47 }
 0x47c   :  { %v425_v48 = vpop.f32.mrf.mxu1 }
 0x47d   :  { %617 = vrcp.f32 %v425_v48 }
 0x47e   :  { %v598_v49 = vpop.f32.mrf.mxu1 }
 0x48a   :  { %v618_v50 = vpop.eup %617 }
 0x48b   :  { %602 = vmatmul.mubr.msk.f32.vlgmr.msra.gmra.mxu0 %vm271_vm9, %v618_v50 }
 0x54b   :  { %v499_v51 = vpop.f32.mrf.mxu0 }
 0x54c   :  { %v503_v52 = vmul.f32 %v616_v47, %v499_v51 }
 0x54d   :  { %v603_v53 = vpop.f32.mrf.mxu0 }
 0x54e   :  { %504 = vst.msk [vmem:[#allocation2] sm:$0xff] %vm355_vm10, %v503_v52 }
 0x54f   :  { %630 = shalt.err (!%p627_p4)
}
 0x550   :  { %514 = dma.vmem_to_hbm [thread:$0]  %s512_s7, 128, %s785_s9, [#allocation3]  }
 0x551   :  { %639 = dma.done.wait [#allocation3], 128  }
 0x552   :  { %640 = vsyncadd [#allocation3], 4294967168 }
 0x553   :  { %518 = vsyncpa [#allocation3], 1 }

</bundles_post_ra>
